<compile_context>
chip_gen: v5e
topology: v5e:2x2
jax: 0.10.0
libtpu: 0.0.40
codegen_flags: <defaults>
</compile_context>

<pallas_src>
import jax
import jax.numpy as jnp
from jax import lax
from jax.experimental import pallas as pl
from jax.experimental.pallas import tpu as pltpu


def _round_up(x, mult):
    return ((x + mult - 1) // mult) * mult


# ----------------------------------------------------------------------------
# Kernel
# ----------------------------------------------------------------------------
def _make_decoder_kernel(n_inputs, num_hidden_layers, out_dim, compute_dtype):
    """Kernel: split first layer over the raw inputs, hidden ReLU stack, fused
    (mu | sigma) head with in-kernel softplus transform on the sigma lanes."""

    def kernel(*refs):
        x_refs = refs[:n_inputs]
        w0_refs = refs[n_inputs:2 * n_inputs]
        b0_ref = refs[2 * n_inputs]
        p = 2 * n_inputs + 1
        layer_refs = refs[p:p + 2 * (num_hidden_layers - 1)]
        p += 2 * (num_hidden_layers - 1)
        w_head_ref = refs[p]
        b_head_ref = refs[p + 1]
        out_ref = refs[p + 2]

        # ---- first layer: no HBM concat, W0 split row-wise over the inputs --
        acc = jnp.dot(x_refs[0][...].astype(compute_dtype), w0_refs[0][...],
                      preferred_element_type=jnp.float32)
        for i in range(1, n_inputs):
            acc = acc + jnp.dot(x_refs[i][...].astype(compute_dtype),
                                w0_refs[i][...],
                                preferred_element_type=jnp.float32)
        h = jnp.maximum(acc + b0_ref[...], 0.0).astype(compute_dtype)

        # ---- remaining hidden layers (Linear + ReLU) -------------------------
        for j in range(num_hidden_layers - 1):
            w = layer_refs[2 * j][...]
            b = layer_refs[2 * j + 1][...]
            h = jnp.maximum(
                jnp.dot(h, w, preferred_element_type=jnp.float32) + b,
                0.0).astype(compute_dtype)

        # ---- fused (mu | sigma) head -----------------------------------------
        head = (jnp.dot(h, w_head_ref[...], preferred_element_type=jnp.float32)
                + b_head_ref[...])
        # Lanes [0, out_dim) -> mu ; lanes [out_dim, 2*out_dim) -> sigma.
        lane = lax.broadcasted_iota(jnp.int32, head.shape, 1)
        is_sigma = (lane >= out_dim) & (lane < 2 * out_dim)
        # softplus(x) = log(1 + exp(x)) computed stably as logaddexp(x, 0).
        sigma = 0.1 + 0.9 * jnp.logaddexp(head, 0.0)
        out_ref[...] = jnp.where(is_sigma, sigma, head).astype(out_ref.dtype)

    return kernel


# ----------------------------------------------------------------------------
# Wrapper (Decoder.forward)
# ----------------------------------------------------------------------------
def decoder_forward(params, target_x, stochastic_rep, deterministic_rep=None,
                    *, compute_dtype=jnp.bfloat16, max_row_tile=1024):
    """JAX / Pallas equivalent of Decoder.forward.

    params: dict with
        'layers'  : list of (W, b) for each hidden Linear, W: (in, out), b: (out,)
        'mu'      : (W, b) for hidden_to_mu
        'sigma'   : (W, b) for hidden_to_sigma
    Returns (mu, sigma), each [batch, num_points, output_dim] in float32.
    """
    if deterministic_rep is not None:
        inputs = (stochastic_rep, deterministic_rep, target_x)
    else:
        inputs = (stochastic_rep, target_x)

    batch_size, num_points = target_x.shape[:2]
    dims = [int(x.shape[-1]) for x in inputs]
    filter_size = sum(dims)
    input_dim = params["layers"][0][0].shape[0]
    assert filter_size == input_dim, (
        "You must match the dimension of input_dim and representations + target_x")

    m = batch_size * num_points
    # (B, N, D) -> (B*N, D) is a free metadata-only view; no cast, no pad.
    xs = [x.reshape(m, d) for x, d in zip(inputs, dims)]

    # --- row tile selection ---------------------------------------------------
    # Largest tile up to max_row_tile (mem-bound: big tiles amortize the
    # ~0.35 us/step overhead). Even step count when >1 so v7x megacore gets a
    # balanced split; rounded only to the f32 sublane multiple (8) and left
    # ragged at the end (Pallas masks the boundary) -> no HBM padding pass.
    grid_steps = int(pl.cdiv(m, max_row_tile))
    if grid_steps > 1 and grid_steps % 2:
        grid_steps += 1
    row_tile = _round_up(int(pl.cdiv(m, grid_steps)), 8)
    # Guard: never schedule a grid step whose whole block is out of range.
    while grid_steps > 1 and (grid_steps - 1) * row_tile >= m:
        grid_steps -= 1

    # --- output head layout ----------------------------------------------------
    out_dim = int(params["mu"][0].shape[1])
    two_out = 2 * out_dim
    # Small heads stay unpadded (masked stores, but 16x fewer write-back bytes
    # for out_dim=4); wide heads are padded to a lane-dense 128 multiple.
    head_width = two_out if two_out <= 128 else _round_up(two_out, 128)

    # --- parameters: split first-layer W row-wise, then hidden layers, then
    # --- fused (mu|sigma) head --------------------------------------------------
    w0, b0 = params["layers"][0]
    flat_params = []
    off = 0
    for d in dims:
        flat_params.append(w0[off:off + d].astype(compute_dtype))
        off += d
    flat_params.append(b0.reshape(1, -1).astype(jnp.float32))
    for (w, b) in params["layers"][1:]:
        flat_params += [w.astype(compute_dtype),
                        b.reshape(1, -1).astype(jnp.float32)]
    w_head = jnp.concatenate([params["mu"][0], params["sigma"][0]], axis=1)
    b_head = jnp.concatenate([params["mu"][1], params["sigma"][1]],
                             axis=0).reshape(1, -1)
    if head_width != two_out:
        w_head = jnp.pad(w_head, ((0, 0), (0, head_width - two_out)))
        b_head = jnp.pad(b_head, ((0, 0), (0, head_width - two_out)))
    flat_params += [w_head.astype(compute_dtype), b_head.astype(jnp.float32)]

    # --- specs ------------------------------------------------------------------
    in_specs = [pl.BlockSpec((row_tile, d), lambda i: (i, 0)) for d in dims]
    in_specs += [pl.BlockSpec(p.shape, lambda i: (0, 0)) for p in flat_params]
    out_spec = pl.BlockSpec((row_tile, head_width), lambda i: (i, 0))

    # --- VMEM budget: real working set + headroom, never 100% of v7x VMEM -------
    in_tile_bytes = sum(row_tile * d * jnp.dtype(x.dtype).itemsize
                        for x, d in zip(xs, dims))
    out_tile_bytes = row_tile * head_width * 4
    param_bytes = sum(int(p.size) * p.dtype.itemsize for p in flat_params)
    working_set = 2 * (in_tile_bytes + out_tile_bytes + param_bytes)  # dbl-buffered
    vmem_limit = int(min(max(2 * working_set + (8 << 20), 32 << 20), 48 << 20))

    kernel = _make_decoder_kernel(len(dims), len(params["layers"]), out_dim,
                                  compute_dtype)

    combined = pl.pallas_call(
        kernel,
        out_shape=jax.ShapeDtypeStruct((m, head_width), jnp.float32),
        grid_spec=pltpu.PrefetchScalarGridSpec(
            num_scalar_prefetch=0,
            grid=(grid_steps,),
            in_specs=in_specs,
            out_specs=out_spec,
        ),
        compiler_params=pltpu.CompilerParams(
            dimension_semantics=("parallel",),
            vmem_limit_bytes=vmem_limit,
        ),
    )(*xs, *flat_params)

    mu = combined[:, :out_dim].reshape(batch_size, num_points, out_dim)
    sigma = combined[:, out_dim:two_out].reshape(batch_size, num_points, out_dim)
    return mu, sigma


# ----------------------------------------------------------------------------
# Deterministic parameter initialization (PyTorch nn.Linear-style uniform).
# ----------------------------------------------------------------------------
def init_decoder_params(key, input_dim, layer_sizes, output_dim):
    params = {"layers": []}
    fan_in = input_dim
    for size in layer_sizes:
        key, kw, kb = jax.random.split(key, 3)
        bound = 1.0 / jnp.sqrt(fan_in)
        w = jax.random.uniform(kw, (fan_in, size), jnp.float32, -bound, bound)
        b = jax.random.uniform(kb, (size,), jnp.float32, -bound, bound)
        params["layers"].append((w, b))
        fan_in = size
    for name in ("mu", "sigma"):
        key, kw, kb = jax.random.split(key, 3)
        bound = 1.0 / jnp.sqrt(fan_in)
        w = jax.random.uniform(kw, (fan_in, output_dim), jnp.float32, -bound, bound)
        b = jax.random.uniform(kb, (output_dim,), jnp.float32, -bound, bound)
        params[name] = (w, b)
    return params


# ----------------------------------------------------------------------------
# Pure-JAX reference for correctness checking.
# ----------------------------------------------------------------------------
def decoder_forward_ref(params, target_x, stochastic_rep, deterministic_rep=None):
    if deterministic_rep is not None:
        hidden = jnp.concatenate(
            (stochastic_rep, deterministic_rep, target_x), axis=-1)
    else:
        hidden = jnp.concatenate((stochastic_rep, target_x), axis=-1)
    b, n, f = hidden.shape
    h = hidden.reshape(-1, f)
    for (w, bias) in params["layers"]:
        h = jnp.maximum(h @ w + bias, 0.0)
    mu = (h @ params["mu"][0] + params["mu"][1]).reshape(b, n, -1)
    log_sigma = (h @ params["sigma"][0] + params["sigma"][1]).reshape(b, n, -1)
    sigma = 0.1 + 0.9 * jax.nn.softplus(log_sigma)
    return mu, sigma


if __name__ == "__main__":
    key = jax.random.PRNGKey(0)

    batch, num_points = 2, 8
    x_dim, latent_dim, det_dim = 3, 16, 13
    layer_sizes = [32, 32]
    output_dim = 4

    key, k1, k2, k3, kp, kp2 = jax.random.split(key, 6)
    target_x = jax.random.normal(k1, (batch, num_points, x_dim), jnp.float32)
    stochastic_rep = jax.random.normal(k2, (batch, num_points, latent_dim),
                                       jnp.float32)
    deterministic_rep = jax.random.normal(k3, (batch, num_points, det_dim),
                                          jnp.float32)

    # ANP path: stochastic + deterministic + target_x.
    params = init_decoder_params(kp, x_dim + latent_dim + det_dim,
                                 layer_sizes, output_dim)
    mu, sigma = decoder_forward(params, target_x, stochastic_rep,
                                deterministic_rep)
    jax.block_until_ready((mu, sigma))

    mu_ref, sigma_ref = decoder_forward_ref(params, target_x, stochastic_rep,
                                            deterministic_rep)
    assert mu.shape == (batch, num_points, output_dim)
    assert sigma.shape == (batch, num_points, output_dim)
    # bf16 matmul inputs/weights with f32 accumulation -> relaxed tolerance.
    assert jnp.allclose(mu, mu_ref, atol=5e-2, rtol=5e-2)
    assert jnp.allclose(sigma, sigma_ref, atol=5e-2, rtol=5e-2)

    # NP path: no deterministic representation.
    params_np = init_decoder_params(kp2, x_dim + latent_dim,
                                    layer_sizes, output_dim)
    mu2, sigma2 = decoder_forward(params_np, target_x, stochastic_rep)
    jax.block_until_ready((mu2, sigma2))
    mu2_ref, sigma2_ref = decoder_forward_ref(params_np, target_x, stochastic_rep)
    assert jnp.allclose(mu2, mu2_ref, atol=5e-2, rtol=5e-2)
    assert jnp.allclose(sigma2, sigma2_ref, atol=5e-2, rtol=5e-2)

    print("KERNEL_OK")
</pallas_src>

<mosaic_0001>
module attributes {stable_mosaic.version = 11 : i64} {
  func.func @kernel(%arg0: i32, %arg1: memref<16x16xf32, #tpu.memory_space<vmem>>, %arg2: memref<16x13xf32, #tpu.memory_space<vmem>>, %arg3: memref<16x3xf32, #tpu.memory_space<vmem>>, %arg4: memref<16x32xbf16, #tpu.memory_space<vmem>>, %arg5: memref<13x32xbf16, #tpu.memory_space<vmem>>, %arg6: memref<3x32xbf16, #tpu.memory_space<vmem>>, %arg7: memref<1x32xf32, #tpu.memory_space<vmem>>, %arg8: memref<32x32xbf16, #tpu.memory_space<vmem>>, %arg9: memref<1x32xf32, #tpu.memory_space<vmem>>, %arg10: memref<32x8xbf16, #tpu.memory_space<vmem>>, %arg11: memref<1x8xf32, #tpu.memory_space<vmem>>, %arg12: memref<16x8xf32, #tpu.memory_space<vmem>>) attributes {dimension_semantics = [#tpu.dimension_semantics<parallel>], iteration_bounds = array<i64: 1>, scalar_prefetch = 0 : i64, scratch_operands = 0 : i64, tpu.core_type = #tpu.core_type<tc>, window_params = [{transform_indices = @transform_0, window_bounds = array<i64: 16, 16>}, {transform_indices = @transform_1, window_bounds = array<i64: 16, 13>}, {transform_indices = @transform_2, window_bounds = array<i64: 16, 3>}, {pipeline_mode = #tpu.pipeline_mode<synchronous>, transform_indices = @transform_3, window_bounds = array<i64: 16, 32>}, {pipeline_mode = #tpu.pipeline_mode<synchronous>, transform_indices = @transform_4, window_bounds = array<i64: 13, 32>}, {pipeline_mode = #tpu.pipeline_mode<synchronous>, transform_indices = @transform_5, window_bounds = array<i64: 3, 32>}, {pipeline_mode = #tpu.pipeline_mode<synchronous>, transform_indices = @transform_6, window_bounds = array<i64: 1, 32>}, {pipeline_mode = #tpu.pipeline_mode<synchronous>, transform_indices = @transform_7, window_bounds = array<i64: 32, 32>}, {pipeline_mode = #tpu.pipeline_mode<synchronous>, transform_indices = @transform_8, window_bounds = array<i64: 1, 32>}, {pipeline_mode = #tpu.pipeline_mode<synchronous>, transform_indices = @transform_9, window_bounds = array<i64: 32, 8>}, {pipeline_mode = #tpu.pipeline_mode<synchronous>, transform_indices = @transform_10, window_bounds = array<i64: 1, 8>}, {transform_indices = @transform_11, window_bounds = array<i64: 16, 8>}]} {
    %c0 = arith.constant 0 : index
    %c0_0 = arith.constant 0 : index
    %0 = vector.load %arg1[%c0, %c0_0] : memref<16x16xf32, #tpu.memory_space<vmem>>, vector<16x16xf32>
    %1 = arith.truncf %0 : vector<16x16xf32> to vector<16x16xbf16>
    %c0_1 = arith.constant 0 : index
    %c0_2 = arith.constant 0 : index
    %2 = vector.load %arg4[%c0_1, %c0_2] : memref<16x32xbf16, #tpu.memory_space<vmem>>, vector<16x32xbf16>
    %cst = arith.constant dense<0.000000e+00> : vector<16x32xf32>
    %3 = tpu.matmul %1, %2, %cst {dimension_numbers = #tpu.dot_dimension_numbers<[1], [0], [0], [1], [0, 0, 1, 1], [], []>} : vector<16x16xbf16>, vector<16x32xbf16>, vector<16x32xf32> -> vector<16x32xf32>
    %c0_3 = arith.constant 0 : index
    %c0_4 = arith.constant 0 : index
    %4 = vector.load %arg2[%c0_3, %c0_4] : memref<16x13xf32, #tpu.memory_space<vmem>>, vector<16x13xf32>
    %5 = arith.truncf %4 : vector<16x13xf32> to vector<16x13xbf16>
    %c0_5 = arith.constant 0 : index
    %c0_6 = arith.constant 0 : index
    %6 = vector.load %arg5[%c0_5, %c0_6] : memref<13x32xbf16, #tpu.memory_space<vmem>>, vector<13x32xbf16>
    %cst_7 = arith.constant dense<0.000000e+00> : vector<16x32xf32>
    %7 = tpu.matmul %5, %6, %cst_7 {dimension_numbers = #tpu.dot_dimension_numbers<[1], [0], [0], [1], [0, 0, 1, 1], [], []>} : vector<16x13xbf16>, vector<13x32xbf16>, vector<16x32xf32> -> vector<16x32xf32>
    %8 = arith.addf %3, %7 : vector<16x32xf32>
    %c0_8 = arith.constant 0 : index
    %c0_9 = arith.constant 0 : index
    %9 = vector.load %arg3[%c0_8, %c0_9] : memref<16x3xf32, #tpu.memory_space<vmem>>, vector<16x3xf32>
    %10 = arith.truncf %9 : vector<16x3xf32> to vector<16x3xbf16>
    %c0_10 = arith.constant 0 : index
    %c0_11 = arith.constant 0 : index
    %11 = vector.load %arg6[%c0_10, %c0_11] : memref<3x32xbf16, #tpu.memory_space<vmem>>, vector<3x32xbf16>
    %cst_12 = arith.constant dense<0.000000e+00> : vector<16x32xf32>
    %12 = tpu.matmul %10, %11, %cst_12 {dimension_numbers = #tpu.dot_dimension_numbers<[1], [0], [0], [1], [0, 0, 1, 1], [], []>} : vector<16x3xbf16>, vector<3x32xbf16>, vector<16x32xf32> -> vector<16x32xf32>
    %13 = arith.addf %8, %12 : vector<16x32xf32>
    %c0_13 = arith.constant 0 : index
    %c0_14 = arith.constant 0 : index
    %14 = vector.load %arg7[%c0_13, %c0_14] : memref<1x32xf32, #tpu.memory_space<vmem>>, vector<1x32xf32>
    %15 = vector.broadcast %14 : vector<1x32xf32> to vector<16x32xf32>
    %16 = arith.addf %13, %15 : vector<16x32xf32>
    %cst_15 = arith.constant 0.000000e+00 : f32
    %17 = vector.broadcast %cst_15 : f32 to vector<16x32xf32>
    %18 = arith.maximumf %16, %17 : vector<16x32xf32>
    %19 = arith.truncf %18 : vector<16x32xf32> to vector<16x32xbf16>
    %c0_16 = arith.constant 0 : index
    %c0_17 = arith.constant 0 : index
    %20 = vector.load %arg8[%c0_16, %c0_17] : memref<32x32xbf16, #tpu.memory_space<vmem>>, vector<32x32xbf16>
    %c0_18 = arith.constant 0 : index
    %c0_19 = arith.constant 0 : index
    %21 = vector.load %arg9[%c0_18, %c0_19] : memref<1x32xf32, #tpu.memory_space<vmem>>, vector<1x32xf32>
    %cst_20 = arith.constant dense<0.000000e+00> : vector<16x32xf32>
    %22 = tpu.matmul %19, %20, %cst_20 {dimension_numbers = #tpu.dot_dimension_numbers<[1], [0], [0], [1], [0, 0, 1, 1], [], []>} : vector<16x32xbf16>, vector<32x32xbf16>, vector<16x32xf32> -> vector<16x32xf32>
    %23 = vector.broadcast %21 : vector<1x32xf32> to vector<16x32xf32>
    %24 = arith.addf %22, %23 : vector<16x32xf32>
    %cst_21 = arith.constant 0.000000e+00 : f32
    %25 = vector.broadcast %cst_21 : f32 to vector<16x32xf32>
    %26 = arith.maximumf %24, %25 : vector<16x32xf32>
    %27 = arith.truncf %26 : vector<16x32xf32> to vector<16x32xbf16>
    %c0_22 = arith.constant 0 : index
    %c0_23 = arith.constant 0 : index
    %28 = vector.load %arg10[%c0_22, %c0_23] : memref<32x8xbf16, #tpu.memory_space<vmem>>, vector<32x8xbf16>
    %cst_24 = arith.constant dense<0.000000e+00> : vector<16x8xf32>
    %29 = tpu.matmul %27, %28, %cst_24 {dimension_numbers = #tpu.dot_dimension_numbers<[1], [0], [0], [1], [0, 0, 1, 1], [], []>} : vector<16x32xbf16>, vector<32x8xbf16>, vector<16x8xf32> -> vector<16x8xf32>
    %c0_25 = arith.constant 0 : index
    %c0_26 = arith.constant 0 : index
    %30 = vector.load %arg11[%c0_25, %c0_26] : memref<1x8xf32, #tpu.memory_space<vmem>>, vector<1x8xf32>
    %31 = vector.broadcast %30 : vector<1x8xf32> to vector<16x8xf32>
    %32 = arith.addf %29, %31 : vector<16x8xf32>
    %33 = tpu.iota {dimensions = array<i32: 1>} : vector<16x8xi32>
    %c4_i32 = arith.constant 4 : i32
    %34 = vector.broadcast %c4_i32 : i32 to vector<16x8xi32>
    %35 = arith.cmpi sge, %33, %34 : vector<16x8xi32>
    %c8_i32 = arith.constant 8 : i32
    %36 = vector.broadcast %c8_i32 : i32 to vector<16x8xi32>
    %37 = arith.cmpi slt, %33, %36 : vector<16x8xi32>
    %38 = arith.andi %35, %37 : vector<16x8xi1>
    %cst_27 = arith.constant 0.000000e+00 : f32
    %39 = vector.broadcast %cst_27 : f32 to vector<16x8xf32>
    %40 = arith.maximumf %32, %39 : vector<16x8xf32>
    %41 = vector.broadcast %cst_27 : f32 to vector<16x8xf32>
    %42 = arith.subf %32, %41 : vector<16x8xf32>
    %43 = arith.cmpf one, %42, %42 : vector<16x8xf32>
    %44 = vector.broadcast %cst_27 : f32 to vector<16x8xf32>
    %45 = arith.addf %32, %44 : vector<16x8xf32>
    %46 = math.absf %42 : vector<16x8xf32>
    %cst_28 = arith.constant 0.000000e+00 : f32
    %47 = vector.broadcast %cst_28 : f32 to vector<16x8xf32>
    %48 = arith.subf %47, %46 : vector<16x8xf32>
    %49 = math.exp %48 : vector<16x8xf32>
    %50 = math.log1p %49 : vector<16x8xf32>
    %51 = arith.addf %40, %50 : vector<16x8xf32>
    %52 = arith.select %43, %45, %51 : vector<16x8xi1>, vector<16x8xf32>
    %cst_29 = arith.constant 0.899999976 : f32
    %53 = vector.broadcast %cst_29 : f32 to vector<16x8xf32>
    %54 = arith.mulf %53, %52 : vector<16x8xf32>
    %cst_30 = arith.constant 1.000000e-01 : f32
    %55 = vector.broadcast %cst_30 : f32 to vector<16x8xf32>
    %56 = arith.addf %55, %54 : vector<16x8xf32>
    %57 = arith.select %38, %56, %32 : vector<16x8xi1>, vector<16x8xf32>
    %c0_31 = arith.constant 0 : index
    %c0_32 = arith.constant 0 : index
    %58 = vector.load %arg12[%c0_31, %c0_32] : memref<16x8xf32, #tpu.memory_space<vmem>>, vector<16x8xf32>
    tpu.vector_store %arg12[%c0_31, %c0_32], %57 {strides = array<i32>} : memref<16x8xf32, #tpu.memory_space<vmem>>, vector<16x8xf32>,
    return
  }
  func.func @transform_0(%arg0: i32) -> (i32, i32) {
    %c0_i32 = arith.constant 0 : i32
    %c0_i32_0 = arith.constant 0 : i32
    return %arg0, %c0_i32 : i32, i32
  }
  func.func @transform_1(%arg0: i32) -> (i32, i32) {
    %c0_i32 = arith.constant 0 : i32
    %c0_i32_0 = arith.constant 0 : i32
    return %arg0, %c0_i32 : i32, i32
  }
  func.func @transform_2(%arg0: i32) -> (i32, i32) {
    %c0_i32 = arith.constant 0 : i32
    %c0_i32_0 = arith.constant 0 : i32
    return %arg0, %c0_i32 : i32, i32
  }
  func.func @transform_3(%arg0: i32) -> (i32, i32) {
    %c0_i32 = arith.constant 0 : i32
    %c0_i32_0 = arith.constant 0 : i32
    %c0_i32_1 = arith.constant 0 : i32
    return %c0_i32, %c0_i32_0 : i32, i32
  }
  func.func @transform_4(%arg0: i32) -> (i32, i32) {
    %c0_i32 = arith.constant 0 : i32
    %c0_i32_0 = arith.constant 0 : i32
    %c0_i32_1 = arith.constant 0 : i32
    return %c0_i32, %c0_i32_0 : i32, i32
  }
  func.func @transform_5(%arg0: i32) -> (i32, i32) {
    %c0_i32 = arith.constant 0 : i32
    %c0_i32_0 = arith.constant 0 : i32
    %c0_i32_1 = arith.constant 0 : i32
    return %c0_i32, %c0_i32_0 : i32, i32
  }
  func.func @transform_6(%arg0: i32) -> (i32, i32) {
    %c0_i32 = arith.constant 0 : i32
    %c0_i32_0 = arith.constant 0 : i32
    %c0_i32_1 = arith.constant 0 : i32
    return %c0_i32, %c0_i32_0 : i32, i32
  }
  func.func @transform_7(%arg0: i32) -> (i32, i32) {
    %c0_i32 = arith.constant 0 : i32
    %c0_i32_0 = arith.constant 0 : i32
    %c0_i32_1 = arith.constant 0 : i32
    return %c0_i32, %c0_i32_0 : i32, i32
  }
  func.func @transform_8(%arg0: i32) -> (i32, i32) {
    %c0_i32 = arith.constant 0 : i32
    %c0_i32_0 = arith.constant 0 : i32
    %c0_i32_1 = arith.constant 0 : i32
    return %c0_i32, %c0_i32_0 : i32, i32
  }
  func.func @transform_9(%arg0: i32) -> (i32, i32) {
    %c0_i32 = arith.constant 0 : i32
    %c0_i32_0 = arith.constant 0 : i32
    %c0_i32_1 = arith.constant 0 : i32
    return %c0_i32, %c0_i32_0 : i32, i32
  }
  func.func @transform_10(%arg0: i32) -> (i32, i32) {
    %c0_i32 = arith.constant 0 : i32
    %c0_i32_0 = arith.constant 0 : i32
    %c0_i32_1 = arith.constant 0 : i32
    return %c0_i32, %c0_i32_0 : i32, i32
  }
  func.func @transform_11(%arg0: i32) -> (i32, i32) {
    %c0_i32 = arith.constant 0 : i32
    %c0_i32_0 = arith.constant 0 : i32
    return %arg0, %c0_i32 : i32, i32
  }
}

</mosaic_0001>

<bundles_post_ra>
// kernel: tpu_custom_call.1
= control target key start
LH: loop header
LB: loop body
LE: loop exit
PB: predicated region body
PF: predicated region fallthrough
CT: control target
= control target key end

     0   :  { %16 = vsyncpa [#allocation3], 0  ;;  %s577_s0 = inlined_call_operand.vmem [shape: f32[16,16], index: 0, kind: input, shape index: {}]   ;;  %s578_s1 = inlined_call_operand.vmem [shape: f32[16,13], index: 1, kind: input, shape index: {}]   ;;  %s579_s2 = inlined_call_operand.vmem [shape: f32[16,3], index: 2, kind: input, shape index: {}]   ;;  %s580_s3 = inlined_call_operand.hbm [shape: bf16[16,32], index: 3, kind: input, shape index: {}]   ;;  %s581_s4 = inlined_call_operand.hbm [shape: bf16[13,32], index: 4, kind: input, shape index: {}]   ;;  %s582_s5 = inlined_call_operand.vmem [shape: bf16[3,32], index: 5, kind: input, shape index: {}]   ;;  %s583_s6 = inlined_call_operand.vmem [shape: f32[1,32], index: 6, kind: input, shape index: {}]   ;;  %s584_s7 = inlined_call_operand.hbm [shape: bf16[32,32], index: 7, kind: input, shape index: {}]   ;;  %s585_s8 = inlined_call_operand.vmem [shape: f32[1,32], index: 8, kind: input, shape index: {}]   ;;  %s586_s9 = inlined_call_operand.vmem [shape: bf16[32,8], index: 9, kind: input, shape index: {}]   ;;  %s587_s10 = inlined_call_operand.vmem [shape: f32[1,8], index: 10, kind: input, shape index: {}]   ;;  %s588_s11 = inlined_call_operand.vmem [shape: f32[16,8], index: 11, kind: output, shape index: {}]  }
   0x1   :  { %17 = vsyncpa [#allocation5], 0  ;;  %s41_s19 = sshll.u32 %s581_s4, 4  ;;  %s452_s20 = smov [#allocation4]   ;;  %s42_s19 = int_to_ptr.hbm [resolvable:$true] %s41_s19 }
   0x2   :  { %s43_s21 = sshll.u32 %s452_s20, 4  ;;  %s28_s24 = sshll.u32 %s580_s3, 4  ;;  %s44_s21 = int_to_ptr.vmem [resolvable:$true] %s43_s21  ;;  %s29_s24 = int_to_ptr.hbm [resolvable:$true] %s28_s24 }
   0x3   :  { %s453_s25 = smov 64   ;;  %s454_s26 = smov 4  }
   0x4   :  { %49 = dma.hbm_to_vmem [thread:$0]  %s42_s19, 128, %s44_s21, [#allocation5], %s453_s25, %s453_s25, %s454_s26  }
   0x5   :  { %s455_s27 = smov [#allocation2]   ;;  %s58_s12 = sshll.u32 %s584_s7, 4  ;;  %s59_s12 = int_to_ptr.hbm [resolvable:$true] %s58_s12 }
   0x6   :  { %s30_s28 = sshll.u32 %s455_s27, 4  ;;  %s456_s4 = smov [#allocation6]   ;;  %s31_s28 = int_to_ptr.vmem [resolvable:$true] %s30_s28 }
   0x7   :  { %36 = dma.hbm_to_vmem [thread:$0]  %s29_s24, 128, %s31_s28, [#allocation3], %s453_s25, %s453_s25, %s454_s26  }
   0x8   :  { %s60_s13 = sshll.u32 %s456_s4, 4  ;;  %s61_s13 = int_to_ptr.vmem [resolvable:$true] %s60_s13 }
   0x9   :  { %66 = dma.hbm_to_vmem [thread:$0]  %s59_s12, 256, %s61_s13, [#allocation5], %s453_s25, %s453_s25, %s454_s26  }
   0xa   :  { %448 = dma.done.wait [#allocation3], 128  }
   0xb   :  { %449 = vsyncadd [#allocation3], 4294967168 }
   0xc   :  { %450 = dma.done.wait [#allocation5], 384  }
   0xd   :  { %451 = vsyncadd [#allocation5], 4294966912  ;;  %vm158_vm0 = vcmask 1040384   ;;  %vm159_vm1 = vcmask 1041408   ;;  %v457_v0 = vmov 65535   ;;  %vm105_vm2 = vcmask 1045504  }
   0xe   :  { %v160_v1 = vsel %vm158_vm0, 4294967295, %v457_v0  ;;  %vm106_vm3 = vcmask 1046528   ;;  %v107_v3 = vsel %vm105_vm2, 4294967295, %v457_v0  ;;  %v353_v4 = vld [vmem:[#allocation2] sm:$0xff]  ;;  %v326_v6 = vld [vmem:[#allocation4] sm:$0xf]  ;;  %v268_v63 = vlaneseq }
   0xf   :  { %v161_v2 = vsel %vm159_vm1, %v160_v1, 0  ;;  %v153_v5 = vld [vmem:[%s582_s5] sm:$0x3]  ;;  %v354_v8 = vld [vmem:[#allocation4] sm:$0x70]  ;;  %v108_v9 = vsel %vm106_vm3, %v107_v3, 0  ;;  %143 = vmatpush.bf16.msra.mxu1 %v353_v4 }
  0x10   :  { %v163_v7 = vand.u32 %v161_v2, %v153_v5  ;;  %v86_v10 = vld [vmem:[%s577_s0] sm:$0xff]  ;;  %v87_v11 = vld [vmem:[%s577_s0 + $0x8] sm:$0xff]  ;;  %v327_v12 = vor.u32 %v354_v8, %v326_v6  ;;  %vm132_vm4 = vcmask 130048   ;;  %vm154_vm5 = vcmask 23552   ;;  %v356_v21 = vld [vmem:[#allocation6 + $0x8] sm:$0xff] }
  0x11   :  { %v88_v13 = vpack.c.bf16 %v87_v11, %v86_v10  ;;  %v150_v14 = vld [vmem:[%s579_s2] sm:$0xff]  ;;  %v151_v15 = vld [vmem:[%s579_s2 + $0x8] sm:$0xff]  ;;  %vm101_vm6 = vcmask 105472   ;;  %220 = vmatpush.bf16.msra.mxu3 %v356_v21  ;;  %v355_v22 = vld [vmem:[#allocation6] sm:$0xff]  ;;  %vm210_vm7 = vcmask 261120   ;;  %v269_v5 = vand.u32 127, %v268_v63 }
  0x12   :  { %v91_v16 = vld [vmem:[%s578_s1] sm:$0xff]  ;;  %172 = vmatpush.bf16.msra.mxu2 %v163_v7  ;;  %v152_v17 = vpack.c.bf16 %v151_v15, %v150_v14  ;;  %v92_v18 = vld [vmem:[%s578_s1 + $0x8] sm:$0xff]  ;;  %v110_v19 = vand.u32 %v327_v12, %v108_v9  ;;  %vm315_vm13 = vcmask 64512  }
  0x13   :  { %333 = vmatmul.msk.bf16.vlgmr.msra.gmra.mxu1 %vm132_vm4, %v88_v13  ;;  %v93_v20 = vpack.c.bf16 %v92_v18, %v91_v16  ;;  %v358_v23 = vld [vmem:[%s586_s9 + $0x8] sm:$0xff]  ;;  %v365_v29 = vld [vmem:[%s583_s6] ss:$0 sm:$0xff]  ;;  %vm270_vm9 = vcmp.ge.s32.totalorder %v269_v5, 4  ;;  %vm271_vm10 = vcmp.lt.s32.totalorder %v269_v5, 8 }
  0x14   :  { %119 = vmatpush.bf16.msra.mxu0 %v110_v19  ;;  %v357_v40 = vld [vmem:[%s586_s9] sm:$0xff]  ;;  %vm563_vm12 = vmand %vm270_vm9, %vm271_vm10 }
  0x15   :  { %334 = vmatmul.msk.bf16.vlgmr.msra.gmra.mxu2 %vm154_vm5, %v152_v17  ;;  %221 = vmatpush.bf16.msra.mxu3 %v355_v22  ;;  %v366_v42 = vld [vmem:[%s585_s8] ss:$0 sm:$0xff] }
  0x16   :  { %v367_v49 = vld [vmem:[%s587_s10] ss:$0 sm:$0xff] }
  0x17   :  { %328 = vmatmul.msk.bf16.vlgmr.msra.gmra.mxu0 %vm101_vm6, %v93_v20 }
  0x18   :  { %260 = vmatpush.bf16.msrb.mxu0 %v358_v23 }
  0x1c   :  { %261 = vmatpush.bf16.msrb.mxu0 %v357_v40 }
  0x90   :  { %v145_v24 = vpop.f32.mrf.mxu1 }
  0x94   :  { %v121_v25 = vpop.f32.mrf.mxu0 }
  0x95   :  { %v146_v27 = vadd.f32 %v145_v24, %v121_v25 }
  0x98   :  { %v174_v26 = vpop.f32.mrf.mxu2  ;;  %v147_v31 = vpop.f32.mrf.mxu1 }
  0x99   :  { %v179_v28 = vadd.f32 %v174_v26, %v146_v27 }
  0x9b   :  { %v185_v34 = vadd.f32 %v365_v29, %v179_v28 }
  0x9c   :  { %v123_v30 = vpop.f32.mrf.mxu0 }
  0x9d   :  { %v148_v32 = vadd.f32 %v147_v31, %v123_v30  ;;  %v187_v37 = vmax.f32 %v185_v34, 0.0 }
  0xa0   :  { %v176_v33 = vpop.f32.mrf.mxu2 }
  0xa1   :  { %v180_v35 = vadd.f32 %v176_v33, %v148_v32 }
  0xa3   :  { %v186_v36 = vadd.f32 %v365_v29, %v180_v35 }
  0xa5   :  { %v188_v38 = vmax.f32 %v186_v36, 0.0 }
  0xa7   :  { %v189_v39 = vpack.c.bf16 %v188_v38, %v187_v37 }
  0xa9   :  { %343 = vmatmul.msk.bf16.vlgmr.msra.gmra.mxu3 %vm210_vm7, %v189_v39 }
 0x12c   :  { %v223_v41 = vpop.f32.mrf.mxu3 }
 0x12d   :  { %v224_v43 = vadd.f32 %v366_v42, %v223_v41 }
 0x12f   :  { %v228_v46 = vmax.f32 %v224_v43, 0.0 }
 0x134   :  { %v225_v44 = vpop.f32.mrf.mxu3 }
 0x135   :  { %v226_v45 = vadd.f32 %v366_v42, %v225_v44 }
 0x137   :  { %v229_v47 = vmax.f32 %v226_v45, 0.0 }
 0x139   :  { %v230_v48 = vpack.c.bf16 %v229_v47, %v228_v46 }
 0x13b   :  { %352 = vmatmul.msk.bf16.vlgmr.msrb.gmra.mxu0 %vm210_vm7, %v230_v48 }
 0x1b8   :  { %v263_v50 = vpop.f32.mrf.mxu0 }
 0x1b9   :  { %v264_v51 = vadd.f32 %v367_v49, %v263_v50 }
 0x1bb   :  { %v279_v52 = vand.u32 2147483647, %v264_v51  ;;  %v273_v9 = vmax.f32 %v264_v51, 0.0  ;;  %vm275_vm11 = vcmp.ne.f32.partialorder %v264_v51, %v264_v51 }
 0x1bd   :  { %v281_v53 = vsub.f32 0.0, %v279_v52 }
 0x1bf   :  { %v283_v54 = vmul.f32 1.442695, %v281_v53 }
 0x1c0   :  { %v265_v55 = vpop.f32.mrf.mxu0 }
 0x1c1   :  { %368 = vpow2.f32 %v283_v54  ;;  %v266_v56 = vadd.f32 %v367_v49, %v265_v55 }
 0x1c3   :  { %v280_v57 = vand.u32 2147483647, %v266_v56  ;;  %v274_v21 = vmax.f32 %v266_v56, 0.0  ;;  %vm276_vm15 = vcmp.ne.f32.partialorder %v266_v56, %v266_v56 }
 0x1c5   :  { %v282_v58 = vsub.f32 0.0, %v280_v57 }
 0x1c7   :  { %v369_v59 = vpop.eup %368  ;;  %v285_v60 = vmul.f32 1.442695, %v282_v58 }
 0x1c8   :  { %v287_v61 = vadd.f32 1.0, %v369_v59  ;;  %v290_v62 = vmul.f32 -0.5, %v369_v59  ;;  %v293_v1 = vand.u32 2147483647, %v369_v59 }
 0x1c9   :  { %370 = vpow2.f32 %v285_v60 }
 0x1ca   :  { %372 = vlog2.f32 %v287_v61  ;;  %v291_v0 = vadd.f32 1.0, %v290_v62  ;;  %vm294_vm8 = vcmp.lt.f32.partialorder %v293_v1, 0.0004427343 }
 0x1cc   :  { %v292_v7 = vmul.f32 %v369_v59, %v291_v0 }
 0x1cf   :  { %v371_v2 = vpop.eup %370 }
 0x1d0   :  { %v373_v3 = vpop.eup %372  ;;  %v296_v4 = vadd.f32 1.0, %v371_v2  ;;  %v299_v8 = vmul.f32 -0.5, %v371_v2  ;;  %v302_v14 = vand.u32 2147483647, %v371_v2 }
 0x1d1   :  { %v289_v6 = vmul.f32 0.6931472, %v373_v3 }
 0x1d2   :  { %374 = vlog2.f32 %v296_v4  ;;  %v300_v12 = vadd.f32 1.0, %v299_v8  ;;  %vm303_vm14 = vcmp.lt.f32.partialorder %v302_v14, 0.0004427343 }
 0x1d3   :  { %v295_v10 = vsel %vm294_vm8, %v292_v7, %v289_v6 }
 0x1d4   :  { %v305_v11 = vadd.f32 %v295_v10, %v273_v9  ;;  %v301_v20 = vmul.f32 %v371_v2, %v300_v12 }
 0x1d6   :  { %v307_v13 = vsel %vm275_vm11, %v264_v51, %v305_v11 }
 0x1d7   :  { %v309_v15 = vmul.f32 0.9, %v307_v13 }
 0x1d8   :  { %v375_v16 = vpop.eup %374 }
 0x1d9   :  { %v311_v18 = vadd.f32 0.1, %v309_v15  ;;  %v298_v19 = vmul.f32 0.6931472, %v375_v16 }
 0x1db   :  { %v313_v22 = vsel %vm563_vm12, %v311_v18, %v264_v51  ;;  %v304_v23 = vsel %vm303_vm14, %v301_v20, %v298_v19 }
 0x1dc   :  { %316 = vst.msk [vmem:[%s588_s11] sm:$0xff] %vm315_vm13, %v313_v22  ;;  %v306_v24 = vadd.f32 %v304_v23, %v274_v21 }
 0x1de   :  { %v308_v25 = vsel %vm276_vm15, %v266_v56, %v306_v24 }
 0x1df   :  { %v310_v26 = vmul.f32 0.9, %v308_v25 }
 0x1e1   :  { %v312_v27 = vadd.f32 0.1, %v310_v26 }
 0x1e3   :  { %v314_v28 = vsel %vm563_vm12, %v312_v27, %v266_v56 }
 0x1e4   :  { %317 = vst.msk [vmem:[%s588_s11 + $0x8] sm:$0xff] %vm315_vm13, %v314_v28 }
 0x1e5   :  { %322 = vsyncpa [#allocation3], 1 }
 0x1e6   :  { %323 = vsyncpa [#allocation5], 1 }

</bundles_post_ra>
